<compile_context>
chip_gen: v7x
topology: tpu7x:2x2x1
jax: 0.10.0
libtpu: 0.0.40
codegen_flags: <defaults>
</compile_context>

<pallas_src>
import functools
import math

import jax
import jax.numpy as jnp
from jax.experimental import pallas as pl
from jax.experimental.pallas import tpu as pltpu

EPS = 1e-5                               # PyTorch default eps (BatchNorm1d / InstanceNorm1d)
_VMEM_LIMIT = 32 * 1024 * 1024           # scoped VMEM budget, safe on v5e / v6e / v7x
_TARGET_BLOCK_BYTES = 2 * 1024 * 1024    # ~2 MiB per streamed input block


def _round_up(x, m):
    return ((x + m - 1) // m) * m


def _choose_block_rows(n_rows, n_cols, itemsize):
    """Row-tile height for the streamed BatchNorm passes: multiple of 8 sublanes,
    512-2048 rows when the problem is large, whole array when it is tiny."""
    rows = _TARGET_BLOCK_BYTES // max(1, n_cols * itemsize)
    rows = min(rows, 2048, _round_up(n_rows, 8))
    rows = max(8, (rows // 8) * 8)
    return rows


# ---------------------------------------------------------------------------
# Kernels
# ---------------------------------------------------------------------------
def _node_feat_kernel(*refs, has_mask, has_drop):
    """Fused NodeFeatures + SkipConnection for one batch element.

    refs: x (N, D), Wu^T (D, D), Wv^T (D, D), bu (1, D), bv (1, D),
          [mask (N, N)], [drop_scale (N, D)], out (N, D)
    """
    x_ref, wu_ref, wv_ref, bu_ref, bv_ref = refs[:5]
    idx = 5
    mask_ref = None
    drop_ref = None
    if has_mask:
        mask_ref = refs[idx]
        idx += 1
    if has_drop:
        drop_ref = refs[idx]
        idx += 1
    o_ref = refs[idx]

    x = x_ref[...].astype(jnp.float32)                                  # (N, D)
    ux = jnp.dot(x, wu_ref[...].astype(jnp.float32),
                 preferred_element_type=jnp.float32) + bu_ref[...].astype(jnp.float32)
    vx = jnp.dot(x, wv_ref[...].astype(jnp.float32),
                 preferred_element_type=jnp.float32) + bv_ref[...].astype(jnp.float32)
    if has_mask:
        # x_new[i] = Ux[i] + sum_j mask[i, j] * Vx[j]  ==  mask @ Vx
        agg = jnp.dot(mask_ref[...].astype(jnp.float32), vx,
                      preferred_element_type=jnp.float32)               # (N, D)
    else:
        agg = jnp.sum(vx, axis=0, keepdims=True)                        # (1, D)
    h = jnp.maximum(ux + agg, 0.0)                                      # ReLU
    if has_drop:
        h = h * drop_ref[...].astype(jnp.float32)                       # inverted dropout
    o_ref[...] = (x + h).astype(o_ref.dtype)                            # skip connection


def _bn_stats_kernel(x_ref, sum_ref, ssq_ref, *, total_rows, block_rows):
    """BatchNorm pass 1: accumulate per-channel sum / sum-of-squares over row tiles."""
    i = pl.program_id(0)

    @pl.when(i == 0)
    def _init():
        sum_ref[...] = jnp.zeros_like(sum_ref)
        ssq_ref[...] = jnp.zeros_like(ssq_ref)

    x = x_ref[...].astype(jnp.float32)                                  # (tm, Dp)
    row = jax.lax.broadcasted_iota(jnp.int32, x.shape, 0) + i * block_rows
    x = jnp.where(row < total_rows, x, 0.0)                             # mask padded rows
    sum_ref[...] += jnp.sum(x, axis=0, keepdims=True)
    ssq_ref[...] += jnp.sum(x * x, axis=0, keepdims=True)


def _bn_apply_kernel(x_ref, scale_ref, shift_ref, o_ref):
    """BatchNorm pass 2: y = x * scale + shift (mean/var/weight/bias folded in)."""
    x = x_ref[...].astype(jnp.float32)
    o_ref[...] = (x * scale_ref[...] + shift_ref[...]).astype(o_ref.dtype)


def _instancenorm_kernel(x_ref, w_ref, b_ref, o_ref):
    """InstanceNorm1d: per-(batch, channel) statistics over the node axis."""
    x = x_ref[...].astype(jnp.float32)                                  # (G, N, D)
    mean = jnp.mean(x, axis=1, keepdims=True)                           # (G, 1, D)
    cent = x - mean
    var = jnp.mean(cent * cent, axis=1, keepdims=True)
    inv = jax.lax.rsqrt(var + EPS)
    o_ref[...] = (cent * inv * w_ref[...] + b_ref[...]).astype(o_ref.dtype)


# ---------------------------------------------------------------------------
# Wrappers
# ---------------------------------------------------------------------------
def node_features_skip_forward(x, wu_t, bu, wv_t, bv, mask=None, drop_scale=None):
    """out = x + dropout(relu(x @ Wu^T + bu + aggregate(x @ Wv^T + bv)))."""
    B, N, D = x.shape
    has_mask = mask is not None
    has_drop = drop_scale is not None

    args = [x, wu_t, wv_t, bu.reshape(1, D), bv.reshape(1, D)]
    in_specs = [
        pl.BlockSpec((None, N, D), lambda b: (b, 0, 0)),   # x[b]
        pl.BlockSpec((D, D), lambda b: (0, 0)),            # Wu^T (resident)
        pl.BlockSpec((D, D), lambda b: (0, 0)),            # Wv^T (resident)
        pl.BlockSpec((1, D), lambda b: (0, 0)),            # bu
        pl.BlockSpec((1, D), lambda b: (0, 0)),            # bv
    ]
    if has_mask:
        args.append(mask.astype(jnp.float32))
        in_specs.append(pl.BlockSpec((None, N, N), lambda b: (b, 0, 0)))
    if has_drop:
        args.append(drop_scale.astype(jnp.float32))
        in_specs.append(pl.BlockSpec((None, N, D), lambda b: (b, 0, 0)))

    itemsize = x.dtype.itemsize
    flops = 4 * B * N * D * D + 6 * B * N * D + (2 * B * N * N * D if has_mask else 0)
    bytes_accessed = (2 * B * N * D * itemsize + 2 * D * D * 4 + 2 * D * 4
                      + (B * N * N * 4 if has_mask else 0)
                      + (B * N * D * 4 if has_drop else 0))

    return pl.pallas_call(
        functools.partial(_node_feat_kernel, has_mask=has_mask, has_drop=has_drop),
        out_shape=jax.ShapeDtypeStruct((B, N, D), x.dtype),
        grid=(B,),
        in_specs=in_specs,
        out_specs=pl.BlockSpec((None, N, D), lambda b: (b, 0, 0)),
        compiler_params=pltpu.CompilerParams(
            dimension_semantics=("parallel",),
            vmem_limit_bytes=_VMEM_LIMIT),
        cost_estimate=pl.CostEstimate(flops=int(flops), transcendentals=0,
                                      bytes_accessed=int(bytes_accessed)),
    )(*args)


def batchnorm1d_forward(x, weight, bias, block_rows=None):
    """BatchNorm1d (training-mode batch statistics, affine) over the flattened
    (-1, D) view, as a streamed two-pass (stats + normalize) pipeline."""
    orig_shape = x.shape
    D = orig_shape[-1]
    M = x.size // D
    itemsize = x.dtype.itemsize

    # Pack the channel axis into full 128-lane rows when possible so both streamed
    # passes do unmasked, lane-dense loads/stores (biggest lever for D < 128).
    pack = 1
    if D < 128 and 128 % D == 0 and M % (128 // D) == 0:
        pack = 128 // D
    Mp, Dp = M // pack, D * pack
    x2p = x.reshape(Mp, Dp)

    if block_rows is None:
        tm = _choose_block_rows(Mp, Dp, max(itemsize, 4))
    else:
        tm = max(8, (int(block_rows) // 8) * 8)
    num_tiles = pl.cdiv(Mp, tm)

    # Pass 1: per-lane sum / sum-of-squares (accumulator-resident output, reduction axis).
    sums_p, ssqs_p = pl.pallas_call(
        functools.partial(_bn_stats_kernel, total_rows=Mp, block_rows=tm),
        out_shape=(jax.ShapeDtypeStruct((1, Dp), jnp.float32),
                   jax.ShapeDtypeStruct((1, Dp), jnp.float32)),
        grid=(num_tiles,),
        in_specs=[pl.BlockSpec((tm, Dp), lambda i: (i, 0))],
        out_specs=(pl.BlockSpec((1, Dp), lambda i: (0, 0)),
                   pl.BlockSpec((1, Dp), lambda i: (0, 0))),
        compiler_params=pltpu.CompilerParams(
            dimension_semantics=("arbitrary",),
            vmem_limit_bytes=_VMEM_LIMIT),
        cost_estimate=pl.CostEstimate(flops=int(3 * M * D), transcendentals=0,
                                      bytes_accessed=int(M * D * itemsize + 8 * Dp)),
    )(x2p)

    # Tiny per-channel math (D elements), folded into a single scale/shift pair.
    sums = sums_p.reshape(pack, D).sum(axis=0, keepdims=True)           # (1, D)
    ssqs = ssqs_p.reshape(pack, D).sum(axis=0, keepdims=True)
    inv_m = 1.0 / float(M)
    mean = sums * inv_m
    var = jnp.maximum(ssqs * inv_m - mean * mean, 0.0)                  # clamp >= 0
    inv = jax.lax.rsqrt(var + EPS)
    scale = weight.reshape(1, D).astype(jnp.float32) * inv
    shift = bias.reshape(1, D).astype(jnp.float32) - mean * scale
    scale_p = jnp.tile(scale, (1, pack))                                # (1, Dp)
    shift_p = jnp.tile(shift, (1, pack))

    # Pass 2: streamed, fully parallel normalize (both TCs on v7x).
    y2p = pl.pallas_call(
        _bn_apply_kernel,
        out_shape=jax.ShapeDtypeStruct((Mp, Dp), x.dtype),
        grid=(num_tiles,),
        in_specs=[pl.BlockSpec((tm, Dp), lambda i: (i, 0)),
                  pl.BlockSpec((1, Dp), lambda i: (0, 0)),
                  pl.BlockSpec((1, Dp), lambda i: (0, 0))],
        out_specs=pl.BlockSpec((tm, Dp), lambda i: (i, 0)),
        compiler_params=pltpu.CompilerParams(
            dimension_semantics=("parallel",),
            vmem_limit_bytes=_VMEM_LIMIT),
        cost_estimate=pl.CostEstimate(flops=int(2 * M * D), transcendentals=0,
                                      bytes_accessed=int(2 * M * D * itemsize + 8 * Dp)),
    )(x2p, scale_p, shift_p)
    return y2p.reshape(orig_shape)


def instancenorm1d_forward(x, weight, bias):
    """InstanceNorm1d (training-mode stats, affine): per-(b, d) stats over N.
    Equivalent to PyTorch permute(0,2,1) -> InstanceNorm1d -> permute(0,2,1)."""
    B, N, D = x.shape
    itemsize = max(x.dtype.itemsize, 4)
    # Group G batch elements per grid step to amortize per-step overhead (a fully
    # lane-dense repack for D < 128 would require an HBM-side relayout).
    G = max(1, min(B, _TARGET_BLOCK_BYTES // max(1, N * D * itemsize)))
    num_blocks = pl.cdiv(B, G)

    return pl.pallas_call(
        _instancenorm_kernel,
        out_shape=jax.ShapeDtypeStruct((B, N, D), x.dtype),
        grid=(num_blocks,),
        in_specs=[pl.BlockSpec((G, N, D), lambda b: (b, 0, 0)),
                  pl.BlockSpec((1, D), lambda b: (0, 0)),
                  pl.BlockSpec((1, D), lambda b: (0, 0))],
        out_specs=pl.BlockSpec((G, N, D), lambda b: (b, 0, 0)),
        compiler_params=pltpu.CompilerParams(
            dimension_semantics=("parallel",),
            vmem_limit_bytes=_VMEM_LIMIT),
        cost_estimate=pl.CostEstimate(flops=int(7 * B * N * D), transcendentals=int(B * D),
                                      bytes_accessed=int(2 * B * N * D * x.dtype.itemsize + 8 * D)),
    )(x, weight.reshape(1, D), bias.reshape(1, D))


# ---------------------------------------------------------------------------
# Module mirrors (forward-pass only)
# ---------------------------------------------------------------------------
class Normalization:
    """JAX/Pallas mirror of the PyTorch `Normalization` module."""

    def __init__(self, embed_dim, normalization="layer", key=None):
        self.embed_dim = embed_dim
        self.normalization = normalization
        if key is None:
            key = jax.random.PRNGKey(0)
        stdv = 1.0 / math.sqrt(embed_dim)            # init_parameters(): U(-stdv, stdv)
        kw, kb = jax.random.split(key)
        self.weight = jax.random.uniform(kw, (embed_dim,), jnp.float32, -stdv, stdv)
        self.bias = jax.random.uniform(kb, (embed_dim,), jnp.float32, -stdv, stdv)

    def __call__(self, x, mask=None):
        if self.normalization == "batch":
            return batchnorm1d_forward(x, self.weight, self.bias)
        if self.normalization == "instance":
            return instancenorm1d_forward(x, self.weight, self.bias)
        if self.normalization == "layer":
            # Faithful to the PyTorch forward(): a LayerNorm normalizer falls into
            # the `else` branch and trips `assert self.normalizer is None`.
            raise AssertionError("Unknown normalizer type")
        return x                                      # unknown -> normalizer is None -> identity


def make_dropout_scale(key, shape, p):
    """Inverted-dropout scale (0 or 1/(1-p)); applied inside the fused kernel."""
    keep = jax.random.bernoulli(key, 1.0 - p, shape)
    return keep.astype(jnp.float32) / (1.0 - p)


class GraphConvNetLayer:
    """JAX/Pallas mirror of the PyTorch `GraphConvNetLayer` (forward only)."""

    def __init__(self, embed_dim, normalization="batch", dropout=0.1, key=None):
        if key is None:
            key = jax.random.PRNGKey(0)
        ks = jax.random.split(key, 5)
        stdv = 1.0 / math.sqrt(embed_dim)            # nn.Linear params: U(-stdv, stdv)
        # Linear weights stored pre-transposed (in, out) so the kernel does x @ W.
        self.u_weight_t = jax.random.uniform(ks[0], (embed_dim, embed_dim), jnp.float32, -stdv, stdv)
        self.u_bias = jax.random.uniform(ks[1], (embed_dim,), jnp.float32, -stdv, stdv)
        self.v_weight_t = jax.random.uniform(ks[2], (embed_dim, embed_dim), jnp.float32, -stdv, stdv)
        self.v_bias = jax.random.uniform(ks[3], (embed_dim,), jnp.float32, -stdv, stdv)
        self.dropout_p = float(dropout)
        self.norm = Normalization(embed_dim, normalization, key=ks[4])

    def __call__(self, x, mask=None, *, training=False, dropout_key=None):
        drop_scale = None
        if training and self.dropout_p > 0.0:
            # TODO(synk): dropout randomness comes from jax.random (applied inside the
            # fused kernel); PyTorch's RNG stream is not bit-reproducible.
            if dropout_key is None:
                dropout_key = jax.random.PRNGKey(0)
            drop_scale = make_dropout_scale(dropout_key, x.shape, self.dropout_p)
        h = node_features_skip_forward(x, self.u_weight_t, self.u_bias,
                                       self.v_weight_t, self.v_bias,
                                       mask=mask, drop_scale=drop_scale)
        return self.norm(h)


# ---------------------------------------------------------------------------
# Pure-JAX references
# ---------------------------------------------------------------------------
def _node_feat_ref(x, wu_t, bu, wv_t, bv, mask=None, drop_scale=None):
    ux = jnp.einsum("bnd,de->bne", x, wu_t) + bu
    vx = jnp.einsum("bnd,de->bne", x, wv_t) + bv
    if mask is None:
        agg = jnp.sum(vx, axis=1, keepdims=True)
    else:
        agg = jnp.einsum("bij,bjd->bid", mask.astype(vx.dtype), vx)
    h = jnp.maximum(ux + agg, 0.0)
    if drop_scale is not None:
        h = h * drop_scale
    return x + h


def _bn_ref(h, w, b):
    D = h.shape[-1]
    h2 = h.reshape(-1, D).astype(jnp.float32)
    mean = jnp.mean(h2, axis=0)
    var = jnp.mean((h2 - mean) ** 2, axis=0)
    y = (h2 - mean) / jnp.sqrt(var + EPS) * w + b
    return y.reshape(h.shape).astype(h.dtype)


def _in_ref(h, w, b):
    hf = h.astype(jnp.float32)
    mean = jnp.mean(hf, axis=1, keepdims=True)
    var = jnp.mean((hf - mean) ** 2, axis=1, keepdims=True)
    y = (hf - mean) / jnp.sqrt(var + EPS) * w + b
    return y.astype(h.dtype)


def _layer_ref(layer, x, mask=None, drop_scale=None):
    h = _node_feat_ref(x, layer.u_weight_t, layer.u_bias,
                       layer.v_weight_t, layer.v_bias,
                       mask=mask, drop_scale=drop_scale)
    return _bn_ref(h, layer.norm.weight, layer.norm.bias)


def _bf16_exact(a):
    # Round test values to bf16-representable numbers so MXU matmul results are
    # independent of the f32 pass configuration (keeps the reference check tight).
    return a.astype(jnp.bfloat16).astype(jnp.float32)


if __name__ == "__main__":
    key = jax.random.PRNGKey(0)
    kx, kp, km, kd, kbig = jax.random.split(key, 5)

    B, N, D = 2, 8, 32                    # batch, num_nodes, embed_dim
    x = _bf16_exact(jax.random.normal(kx, (B, N, D), jnp.float32))

    layer = GraphConvNetLayer(D, normalization="batch", dropout=0.1, key=kp)
    for name in ("u_weight_t", "u_bias", "v_weight_t", "v_bias"):
        setattr(layer, name, _bf16_exact(getattr(layer, name)))

    tol = dict(rtol=1e-3, atol=1e-3)

    # 1) eval-style forward (dropout off), no mask
    y = jax.block_until_ready(layer(x))
    assert y.shape == x.shape and y.dtype == x.dtype
    assert jnp.allclose(y, _layer_ref(layer, x), **tol)

    # 2) masked forward (mask over the node-aggregation)
    mask = jax.random.bernoulli(km, 0.5, (B, N, N)).astype(jnp.float32)
    y_m = jax.block_until_ready(layer(x, mask=mask))
    assert jnp.allclose(y_m, _layer_ref(layer, x, mask=mask), **tol)

    # 3) training-mode forward (dropout applied in-kernel from a jax.random mask)
    y_t = jax.block_until_ready(layer(x, training=True, dropout_key=kd))
    drop_scale = make_dropout_scale(kd, x.shape, layer.dropout_p)
    assert jnp.allclose(y_t, _layer_ref(layer, x, drop_scale=drop_scale), **tol)

    # 4) multi-tile streamed BatchNorm (partial last tile + packed lanes exercised)
    x_big = jax.random.normal(kbig, (2, 100, D), jnp.float32)
    w_n, b_n = layer.norm.weight, layer.norm.bias
    y_big = jax.block_until_ready(batchnorm1d_forward(x_big, w_n, b_n, block_rows=16))
    assert jnp.allclose(y_big, _bn_ref(x_big, w_n, b_n), **tol)

    # 5) InstanceNorm path of the Normalization module
    norm_in = Normalization(D, normalization="instance", key=kp)
    y_in = jax.block_until_ready(norm_in(x))
    assert jnp.allclose(y_in, _in_ref(x, norm_in.weight, norm_in.bias), **tol)

    # 6) unknown normalizer -> identity; 'layer' -> AssertionError (as in torch)
    assert jnp.array_equal(Normalization(D, normalization="none", key=kp)(x), x)
    try:
        Normalization(D, normalization="layer", key=kp)(x)
        raise RuntimeError("expected AssertionError for 'layer' normalization")
    except AssertionError:
        pass

    print("KERNEL_OK")
</pallas_src>

<mosaic_0001>
module attributes {stable_mosaic.version = 11 : i64} {
  func.func @_node_feat_kernel(%arg0: i32, %arg1: memref<1x8x32xf32, #tpu.memory_space<vmem>>, %arg2: memref<32x32xf32, #tpu.memory_space<vmem>>, %arg3: memref<32x32xf32, #tpu.memory_space<vmem>>, %arg4: memref<1x32xf32, #tpu.memory_space<vmem>>, %arg5: memref<1x32xf32, #tpu.memory_space<vmem>>, %arg6: memref<1x8x32xf32, #tpu.memory_space<vmem>>) attributes {dimension_semantics = [#tpu.dimension_semantics<parallel>], iteration_bounds = array<i64: 2>, scalar_prefetch = 0 : i64, scratch_operands = 0 : i64, tpu.core_type = #tpu.core_type<tc>, window_params = [{transform_indices = @transform_0, window_bounds = array<i64: 1, 8, 32>}, {pipeline_mode = #tpu.pipeline_mode<synchronous>, transform_indices = @transform_1, window_bounds = array<i64: 32, 32>}, {pipeline_mode = #tpu.pipeline_mode<synchronous>, transform_indices = @transform_2, window_bounds = array<i64: 32, 32>}, {pipeline_mode = #tpu.pipeline_mode<synchronous>, transform_indices = @transform_3, window_bounds = array<i64: 1, 32>}, {pipeline_mode = #tpu.pipeline_mode<synchronous>, transform_indices = @transform_4, window_bounds = array<i64: 1, 32>}, {transform_indices = @transform_5, window_bounds = array<i64: 1, 8, 32>}]} {
    %c0 = arith.constant 0 : index
    %c0_0 = arith.constant 0 : index
    %c0_1 = arith.constant 0 : index
    %0 = vector.load %arg1[%c0, %c0_0, %c0_1] : memref<1x8x32xf32, #tpu.memory_space<vmem>>, vector<1x8x32xf32>
    %1 = vector.shape_cast %0 : vector<1x8x32xf32> to vector<8x32xf32>
    %c0_2 = arith.constant 0 : index
    %c0_3 = arith.constant 0 : index
    %2 = vector.load %arg2[%c0_2, %c0_3] : memref<32x32xf32, #tpu.memory_space<vmem>>, vector<32x32xf32>
    %cst = arith.constant dense<0.000000e+00> : vector<8x32xf32>
    %3 = tpu.matmul %1, %2, %cst {dimension_numbers = #tpu.dot_dimension_numbers<[1], [0], [0], [1], [0, 0, 1, 1], [], []>} : vector<8x32xf32>, vector<32x32xf32>, vector<8x32xf32> -> vector<8x32xf32>
    %c0_4 = arith.constant 0 : index
    %c0_5 = arith.constant 0 : index
    %4 = vector.load %arg4[%c0_4, %c0_5] : memref<1x32xf32, #tpu.memory_space<vmem>>, vector<1x32xf32>
    %5 = vector.broadcast %4 : vector<1x32xf32> to vector<8x32xf32>
    %6 = arith.addf %3, %5 : vector<8x32xf32>
    %c0_6 = arith.constant 0 : index
    %c0_7 = arith.constant 0 : index
    %7 = vector.load %arg3[%c0_6, %c0_7] : memref<32x32xf32, #tpu.memory_space<vmem>>, vector<32x32xf32>
    %cst_8 = arith.constant dense<0.000000e+00> : vector<8x32xf32>
    %8 = tpu.matmul %1, %7, %cst_8 {dimension_numbers = #tpu.dot_dimension_numbers<[1], [0], [0], [1], [0, 0, 1, 1], [], []>} : vector<8x32xf32>, vector<32x32xf32>, vector<8x32xf32> -> vector<8x32xf32>
    %c0_9 = arith.constant 0 : index
    %c0_10 = arith.constant 0 : index
    %9 = vector.load %arg5[%c0_9, %c0_10] : memref<1x32xf32, #tpu.memory_space<vmem>>, vector<1x32xf32>
    %10 = vector.broadcast %9 : vector<1x32xf32> to vector<8x32xf32>
    %11 = arith.addf %8, %10 : vector<8x32xf32>
    %cst_11 = arith.constant dense<0.000000e+00> : vector<32xf32>
    %12 = vector.multi_reduction <add>, %11, %cst_11 [0] : vector<8x32xf32> to vector<32xf32>
    %13 = vector.shape_cast %12 : vector<32xf32> to vector<1x32xf32>
    %14 = vector.broadcast %13 : vector<1x32xf32> to vector<8x32xf32>
    %15 = arith.addf %6, %14 : vector<8x32xf32>
    %cst_12 = arith.constant 0.000000e+00 : f32
    %16 = vector.broadcast %cst_12 : f32 to vector<8x32xf32>
    %17 = arith.maximumf %15, %16 : vector<8x32xf32>
    %18 = arith.addf %1, %17 : vector<8x32xf32>
    %c0_13 = arith.constant 0 : index
    %c0_14 = arith.constant 0 : index
    %c0_15 = arith.constant 0 : index
    %19 = vector.load %arg6[%c0_13, %c0_14, %c0_15] : memref<1x8x32xf32, #tpu.memory_space<vmem>>, vector<1x8x32xf32>
    %20 = vector.shape_cast %19 : vector<1x8x32xf32> to vector<8x32xf32>
    %21 = vector.shape_cast %18 : vector<8x32xf32> to vector<1x8x32xf32>
    tpu.vector_store %arg6[%c0_13, %c0_14, %c0_15], %21 {strides = array<i32>} : memref<1x8x32xf32, #tpu.memory_space<vmem>>, vector<1x8x32xf32>,
    return
  }
  func.func @transform_0(%arg0: i32) -> (i32, i32, i32) {
    %c0_i32 = arith.constant 0 : i32
    %c0_i32_0 = arith.constant 0 : i32
    %c0_i32_1 = arith.constant 0 : i32
    return %arg0, %c0_i32, %c0_i32_0 : i32, i32, i32
  }
  func.func @transform_1(%arg0: i32) -> (i32, i32) {
    %c0_i32 = arith.constant 0 : i32
    %c0_i32_0 = arith.constant 0 : i32
    %c0_i32_1 = arith.constant 0 : i32
    return %c0_i32, %c0_i32_0 : i32, i32
  }
  func.func @transform_2(%arg0: i32) -> (i32, i32) {
    %c0_i32 = arith.constant 0 : i32
    %c0_i32_0 = arith.constant 0 : i32
    %c0_i32_1 = arith.constant 0 : i32
    return %c0_i32, %c0_i32_0 : i32, i32
  }
  func.func @transform_3(%arg0: i32) -> (i32, i32) {
    %c0_i32 = arith.constant 0 : i32
    %c0_i32_0 = arith.constant 0 : i32
    %c0_i32_1 = arith.constant 0 : i32
    return %c0_i32, %c0_i32_0 : i32, i32
  }
  func.func @transform_4(%arg0: i32) -> (i32, i32) {
    %c0_i32 = arith.constant 0 : i32
    %c0_i32_0 = arith.constant 0 : i32
    %c0_i32_1 = arith.constant 0 : i32
    return %c0_i32, %c0_i32_0 : i32, i32
  }
  func.func @transform_5(%arg0: i32) -> (i32, i32, i32) {
    %c0_i32 = arith.constant 0 : i32
    %c0_i32_0 = arith.constant 0 : i32
    %c0_i32_1 = arith.constant 0 : i32
    return %arg0, %c0_i32, %c0_i32_0 : i32, i32, i32
  }
}

</mosaic_0001>

<bundles_post_ra>
// kernel: tpu_custom_call.1
= control target key start
LH: loop header
LB: loop body
LE: loop exit
PB: predicated region body
PF: predicated region fallthrough
CT: control target
= control target key end

     0   :  { %10 = vsyncpa [#allocation3], 0  ;;  %s1126_s0 = inlined_call_operand.hbm [shape: f32[2,8,32], index: 0, kind: input, shape index: {}]   ;;  %s1127_s1 = inlined_call_operand.hbm [shape: f32[32,32], index: 1, kind: input, shape index: {}]   ;;  %s1128_s2 = inlined_call_operand.hbm [shape: f32[32,32], index: 2, kind: input, shape index: {}]   ;;  %s1129_s3 = inlined_call_operand.vmem [shape: f32[1,32], index: 3, kind: input, shape index: {}]   ;;  %s1130_s4 = inlined_call_operand.vmem [shape: f32[1,32], index: 4, kind: input, shape index: {}]   ;;  %s1131_s5 = inlined_call_operand.hbm [shape: f32[2,8,32], index: 5, kind: output, shape index: {}]  }
   0x1   :  { %12 = vsyncpa [#allocation3 + $0x1], 0 }
   0x2   :  { %13 = vsyncpa [#allocation6], 0 }
   0x3   :  { %14 = vsyncpa [#allocation4], 0 }
   0x4   :  { %16 = vsyncpa [#allocation4 + $0x1], 0  ;;  %s883_s18 = smov 0   ;;  %s885_s19 = smov 0  }
   0x5   :  { %s887_s20 = smov 0   ;;  %s889_s21 = smov 0  }
   0x6 LB: > { %s904_s22 = sadd.s32 4294967295, %s842_s21   ;;  %s550_s23 = sadd.s32 4294967294, %s842_s21   ;;  %s842_s21 = sphi %s889_s21, %s1151_s21   ;;  %s838_s20 = sphi %s887_s20, %s1150_s20   ;;  %s834_s19 = sphi %s885_s19, %s1149_s19   ;;  %s830_s18 = sphi %s883_s18, %s1148_s18  }
   0x7   : > { %p42_p0 = scmp.ne.s32.totalorder %s834_s19, %s830_s18  ;;  %p1132_p1 = scmp.eq.s32.totalorder %s904_s22, 0 }
   0x8   : > { %p156_p3 = scmp.eq.s32.totalorder %s550_s23, 1  ;;  %p551_p5 = scmp.ge.s32.totalorder %s842_s21, 1 }
   0x9   : > { %p913_p4 = por %p1132_p1, %p42_p0  ;;  %p163_p7 = scmp.lt.s32.totalorder %s842_s21, 3 }
   0xa   : > { %p918_p6 = por %p156_p3, %p42_p0  ;;  %s844_s27 = smov [#allocation5]  }
   0xb   : > { %s1135_s24 = scalar_select %p913_p4, 1, 0 }
   0xc   : > { %s1136_s25 = scalar_select %p918_p6, 1, 0 }
   0xd   : > { %p923_p8 = pnand %p551_p5, %p163_p7  ;;  %s175_s28 = sshll.u32 %s844_s27, 4  ;;  %s927_s28 = int_to_ptr.vmem [resolvable:$true] %s175_s28 }
   0xe   : > { %s845_s30 = smov [#allocation7]   ;;  %s686_s9 = scalar_lea.hbm %s1127_s1, 512 }
   0xf   : > { %p626_p9 = pneg %p923_p8  ;;  %s188_s6 = sshll.u32 %s845_s30, 4  ;;  %s938_s6 = int_to_ptr.vmem [resolvable:$true] %s188_s6 }
  0x10   : > { %p687_p12 = scmp.ne.s32.totalorder %s1127_s1, %s686_s9  ;;  %p693_p5 = scmp.lt.u32.totalorder %s686_s9, %s1127_s1 }
  0x11   : > { %p934_p11 = pnand %p626_p9, %p1132_p1 }
  0x13   : > { %p688_p13 = pneg %p934_p11 }
  0x15   : > { %p689_p0 = pnand %p688_p13, %p687_p12 }
  0x17   : > { %p690_p3 = pneg %p689_p0 }
  0x19   : > { %p695_p7 = pnand %p693_p5, %p690_p3 }
  0x1b   : > { %698 = shalt.err (!%p695_p7)
}
  0x1c   : > { %s699_s14 = scalar_lea.vmem %s927_s28, 512  ;;  %p707_p2 = scmp.lt.s32.totalorder %s927_s28, %s927_s28 }
  0x1d   : > { %p700_p9 = scmp.ne.s32.totalorder %s927_s28, %s699_s14  ;;  %p708_p12 = scmp.lt.s32.totalorder %s699_s14, %s699_s14 }
  0x1f   : > { %p702_p10 = pnand %p700_p9, %p688_p13  ;;  %p709_p0 = por %p708_p12, %p707_p2 }
  0x21   : > { %p703_p1 = pneg %p702_p10 }
  0x23   : > { %p710_p6 = pnand %p709_p0, %p703_p1 }
  0x25   : > { %713 = shalt.err (!%p710_p6)
}
  0x26   : > { %s846_s15 = smov 128   ;;  %s847_s16 = smov 8  }
  0x27   : > { %629 = dma.hbm_to_vmem [thread:$0]  (!%p934_p11), %s1127_s1, 512, %s927_s28, [#allocation6], %s846_s15, %s846_s15, %s847_s16  }
  0x28   : > { %s714_s7 = scalar_lea.hbm %s1128_s2, 512 }
  0x29   : > { %p715_p2 = scmp.ne.s32.totalorder %s1128_s2, %s714_s7  ;;  %p721_p10 = scmp.lt.u32.totalorder %s714_s7, %s1128_s2 }
  0x2b   : > { %p717_p1 = pnand %p715_p2, %p688_p13 }
  0x2d   : > { %p718_p6 = pneg %p717_p1 }
  0x2f   : > { %p723_p3 = pnand %p721_p10, %p718_p6 }
  0x31   : > { %726 = shalt.err (!%p723_p3)
}
  0x32   : > { %s727_s28 = scalar_lea.vmem %s938_s6, 512  ;;  %p735_p12 = scmp.lt.s32.totalorder %s938_s6, %s938_s6 }
  0x33   : > { %p728_p5 = scmp.ne.s32.totalorder %s938_s6, %s727_s28  ;;  %p736_p0 = scmp.lt.s32.totalorder %s727_s28, %s727_s28 }
  0x35   : > { %p730_p7 = pnand %p728_p5, %p688_p13  ;;  %p737_p2 = por %p736_p0, %p735_p12 }
  0x37   : > { %p731_p9 = pneg %p730_p7 }
  0x39   : > { %p738_p1 = pnand %p737_p2, %p731_p9 }
  0x3b   : > { %741 = shalt.err (!%p738_p1)
}
  0x3c   : > { %632 = dma.hbm_to_vmem [thread:$0]  (!%p934_p11), %s1128_s2, 512, %s938_s6, [#allocation6], %s846_s15, %s846_s15, %s847_s16  }
  0x3d   : > { %s993_s14 = sadd.s32 1, %s842_s21   ;;  %s29_s29 = sadd.s32 1, %s838_s20 }
  0x3e   : > { %s26_s17 = ssub.s32 %s842_s21, %s993_s14  ;;  %p36_p13 = scmp.ne.s32.totalorder %s838_s20, %s834_s19 }
  0x3f   : > { %p27_p6 = scmp.eq.s32.totalorder %s26_s17, 0  ;;  %p37_p10 = scmp.eq.s32.totalorder %s842_s21, 0 }
  0x40   : > { %p1139_p3 = scmp.eq.s32.totalorder %s904_s22, 1  ;;  %p643_p7 = scmp.lt.s32.totalorder %s842_s21, 2 }
  0x41   : > { %s1009_s27 = scalar_select %p27_p6, %s838_s20, %s29_s29  }
  0x42   : > { %p1003_p5 = por %p1139_p3, %p36_p13  ;;  %p38_p9 = por %p37_p10, %p36_p13 }
  0x43   : > { %s208_s30 = sand.u32 1, %s838_s20   ;;  %s556_s6 = sshll.u32 %s842_s21, 7 }
  0x44   : > { %s1140_s23 = scalar_select %p1003_p5, 1, 0 }
  0x45   : > { %s555_s7 = sshll.u32 %s208_s30, 3  ;;  %s1016_s8 = scalar_lea.hbm %s1126_s0, %s556_s6 }
  0x46   : > { %s212_s9 = scalar_lea.vmem [#allocation2], %s555_s7  ;;  %p1020_p11 = pnand %p643_p7, %p38_p9 }
  0x47   : > { %s219_s10 = sshll.u32 %s212_s9, 4  ;;  %s209_s28 = scalar_lea.sflag [#allocation3], %s208_s30  ;;  %s1018_s10 = int_to_ptr.vmem [resolvable:$true] %s219_s10 }
  0x48   : > { %s742_s12 = scalar_lea.hbm %s1016_s8, 128  ;;  %p744_p0 = pneg %p1020_p11 }
  0x49   : > { %p743_p12 = scmp.ne.s32.totalorder %s1016_s8, %s742_s12  ;;  %s747_s17 = scalar_lea.hbm %s1126_s0, 256 }
  0x4a   : > { %p748_p13 = scmp.lt.u32.totalorder %s1016_s8, %s1126_s0  ;;  %p749_p6 = scmp.lt.u32.totalorder %s747_s17, %s742_s12 }
  0x4b   : > { %p745_p2 = pnand %p744_p0, %p743_p12  ;;  %p751_p3 = scmp.lt.u32.totalorder %s742_s12, %s1016_s8 }
  0x4c   : > { %p750_p10 = por %p749_p6, %p748_p13 }
  0x4d   : > { %p746_p1 = pneg %p745_p2 }
  0x4e   : > { %p752_p7 = por %p751_p3, %p750_p10 }
  0x50   : > { %p753_p9 = pnand %p752_p7, %p746_p1 }
  0x52   : > { %756 = shalt.err (!%p753_p9)
}
  0x53   : > { %s757_s30 = scalar_lea.vmem %s1018_s10, 128  ;;  %s848_s15 = smov [#allocation2]  }
  0x54   : > { %p758_p12 = scmp.ne.s32.totalorder %s1018_s10, %s757_s30  ;;  %s762_s16 = sshll.u32 %s848_s15, 4  ;;  %s763_s16 = int_to_ptr.vmem [resolvable:$false] %s762_s16 }
  0x55   : > { %s764_s9 = scalar_lea.vmem %s763_s16, 256  ;;  %p765_p4 = scmp.lt.s32.totalorder %s1018_s10, %s763_s16 }
  0x56   : > { %p760_p2 = pnand %p758_p12, %p744_p0  ;;  %p766_p13 = scmp.lt.s32.totalorder %s764_s9, %s757_s30 }
  0x58   : > { %p761_p5 = pneg %p760_p2  ;;  %p767_p6 = por %p766_p13, %p765_p4 }
  0x5a   : > { %p768_p10 = pnand %p767_p6, %p761_p5 }
  0x5c   : > { %771 = shalt.err (!%p768_p10)
}
  0x5d   : > { %636 = dma.hbm_to_vmem [thread:$0]  (!%p1020_p11), %s1016_s8, 128, %s1018_s10, %s209_s28  }
  0x5e   : > { %228 = sbr.rel (%p923_p8) target bundleno = 362 (0x16a), region = 40  ;;  %s1052_s12 = sand.u32 (!%p923_p8), 1, %s834_s19  }
  0x5f   : > { %s558_s13 = sshll.u32 (!%p923_p8), %s1052_s12, 3  ;;  %s231_s29 = scalar_lea.sflag (!%p923_p8), [#allocation3], %s1052_s12 }
  0x60   : > { %s234_s17 = scalar_lea.vmem (!%p923_p8), [#allocation2], %s558_s13  ;;  %p1142_p4 = scmp.ne.s32.totalorder (!%p923_p8), %s1135_s24, 0 }
  0x65   : > { %817 = dma.done.wait (%p1142_p4), %s231_s29, 128  }
  0x66   : > { %819 = vsyncadd (%p1142_p4), %s231_s29, 4294967168  ;;  %p1143_p5 = scmp.eq.s32.totalorder %s904_s22, 0 }
  0x68   : > { %821 = dma.done.wait (%p1143_p5), [#allocation6], 1024   ;;  %p1144_p8 = pmov %p1143_p5 }
  0x69   : > { %v849_v0 = vmov 0.0|0.0   ;;  %vm850_vm0 = vmmov 0   ;;  %v851_v1 = vmov 0.0   ;;  %v355_v2 = vld [vmem:[#allocation7] sm:$0xff]  ;;  %v356_v3 = vld [vmem:[#allocation7 + $0x8] sm:$0xff]  ;;  %v357_v4 = vld [vmem:[#allocation7 + $0x10] sm:$0xff] }
  0x6a   : > { %823 = vsyncadd (%p1144_p8), [#allocation6], 4294966272  ;;  %608 = vmatprep.subr.bf16.mxu1 %v849_v0  ;;  %599 = vmatprep.mubr.msk.f32.mxu1 %vm850_vm0, %v851_v1  ;;  %v609_v5 = vpack.c.bf16 %v356_v3, %v355_v2  ;;  %v358_v6 = vld [vmem:[#allocation7 + $0x18] sm:$0xff]  ;;  %v270_v7 = vld [vmem:[#allocation5] sm:$0xff]  ;;  %vm281_vm1 = vcmask 261120   ;;  %s567_s11 = sshll.u32 %s904_s22, 7 }
  0x6b   : > { %602 = vmatprep.subr.bf16.mxu0 %v849_v0  ;;  %588 = vmatprep.mubr.msk.f32.mxu0 %vm850_vm0, %v851_v1  ;;  %v271_v8 = vld [vmem:[#allocation5 + $0x8] sm:$0xff]  ;;  %v272_v9 = vld [vmem:[#allocation5 + $0x10] sm:$0xff]  ;;  %v273_v10 = vld [vmem:[#allocation5 + $0x18] sm:$0xff]  ;;  %v612_v11 = vpack.c.bf16 %v358_v6, %v357_v4  ;;  %s268_s28 = scalar_lea.vmem [#allocation8], %s558_s13  ;;  %s1081_s15 = scalar_lea.hbm %s1131_s5, %s567_s11 }
  0x6c   : > { %610 = vmatpush3.bf16.msra.mxu1 %v609_v5  ;;  %v603_v12 = vpack.c.bf16 %v271_v8, %v270_v7  ;;  %v606_v13 = vpack.c.bf16 %v273_v10, %v272_v9  ;;  %v269_v14 = vld [vmem:[%s234_s17] sm:$0xff]  ;;  %s461_s7 = sshll.u32 %s268_s28, 4  ;;  %s448_s16 = scalar_lea.sflag [#allocation4], %s1052_s12  ;;  %s1083_s7 = int_to_ptr.vmem [resolvable:$true] %s461_s7 }
  0x6d   : > { %611 = vmatprep.subr.bf16.mxu1 %v849_v0  ;;  %v564_v15 = vld [vmem:[%s1130_s4] ss:$0 sm:$0xff]  ;;  %s772_s9 = scalar_lea.vmem %s1083_s7, 128  ;;  %p1145_p0 = scmp.ne.s32.totalorder %s1140_s23, 0 }
  0x6e   : > { %604 = vmatpush3.bf16.msra.mxu0 %v603_v12  ;;  %v562_v25 = vld [vmem:[%s1129_s3] ss:$0 sm:$0xff]  ;;  %p773_p11 = scmp.ne.s32.totalorder %s1083_s7, %s772_s9  ;;  %s852_s22 = smov [#allocation8]  }
  0x6f   : > { %605 = vmatprep.subr.bf16.mxu0 %v849_v0  ;;  %s776_s13 = sshll.u32 %s852_s22, 4  ;;  %s777_s13 = int_to_ptr.vmem [resolvable:$false] %s776_s13 }
  0x70   : > { %613 = vmatpush3.bf16.msra.mxu1 %v612_v11  ;;  %p774_p1 = pnand %p773_p11, %p1145_p0  ;;  %s778_s29 = scalar_lea.vmem %s777_s13, 256 }
  0x71   : > { %p779_p7 = scmp.lt.s32.totalorder %s1083_s7, %s777_s13  ;;  %p780_p9 = scmp.lt.s32.totalorder %s778_s29, %s772_s9 }
  0x72   : > { %607 = vmatpush3.bf16.msra.mxu0 %v606_v13  ;;  %p775_p3 = pneg %p774_p1 }
  0x73   : > { %600 = vmatmul.mubr.msk.f32.vlgmr.msra.gmra.mrb[0].mxu1 %vm281_vm1, %v269_v14  ;;  %p781_p12 = por %p780_p9, %p779_p7 }
  0x75   : > { %589 = vmatmul.mubr.msk.f32.vlgmr.msra.gmra.mrb[0].mxu0 %vm281_vm1, %v269_v14  ;;  %p782_p2 = pnand %p781_p12, %p775_p3 }
 0x146   : > { %v432_v16 = vpop.f32.mrb[0].mxu1 }
 0x147   : > { %v433_v17 = vadd.f32 %v564_v15, %v432_v16  ;;  %v601_v18 = vpop.f32.mrb[1].mxu1 }
 0x148   : > { %v351_v19 = vpop.f32.mrb[0].mxu0 }
 0x149   : > { %v436_v20 = vsel %vm281_vm1, %v433_v17, 0.0  ;;  %v590_v21 = vpop.f32.mrb[1].mxu0  ;;  %v352_v27 = vadd.f32 %v562_v25, %v351_v19 }
 0x14a   : > { %v437_v22 = vrot.slane %v436_v20, 4 }
 0x14c   : > { %v438_v23 = vadd.f32 %v437_v22, %v436_v20 }
 0x14e   : > { %v439_v24 = vrot.slane %v438_v23, 2 }
 0x150   : > { %v440_v26 = vadd.f32 %v439_v24, %v438_v23 }
 0x152   : > { %v441_v28 = vrot.slane %v440_v26, 1 }
 0x154   : > { %v442_v29 = vadd.f32 %v441_v28, %v440_v26 }
 0x156   : > { %v443_v30 = vadd.f32 %v442_v29, %v352_v27 }
 0x158   : > { %v444_v31 = vmax.f32 %v443_v30, 0.0 }
 0x15a   : > { %v445_v32 = vadd.f32 %v444_v31, %v269_v14 }
 0x15c   : > { %446 = vst.msk [vmem:[%s268_s28] sm:$0xff] %vm281_vm1, %v445_v32 }
 0x15d   : > { %785 = shalt.err (!%p782_p2)
}
 0x15e   : > { %s786_s12 = scalar_lea.hbm %s1081_s15, 128  ;;  %s790_s26 = scalar_lea.hbm %s1131_s5, 256 }
 0x15f   : > { %p787_p13 = scmp.ne.s32.totalorder %s1081_s15, %s786_s12  ;;  %p791_p4 = scmp.lt.u32.totalorder %s1081_s15, %s1131_s5 }
 0x160   : > { %p792_p5 = scmp.lt.u32.totalorder %s790_s26, %s786_s12  ;;  %p794_p11 = scmp.lt.u32.totalorder %s786_s12, %s1081_s15 }
 0x161   : > { %p788_p6 = pnand %p787_p13, %p1145_p0 }
 0x162   : > { %p793_p8 = por %p792_p5, %p791_p4 }
 0x163   : > { %p789_p10 = pneg %p788_p6 }
 0x164   : > { %p795_p1 = por %p794_p11, %p793_p8 }
 0x166   : > { %p796_p3 = pnand %p795_p1, %p789_p10 }
 0x168   : > { %799 = shalt.err (!%p796_p3)
}
 0x169   : > { %624 = dma.vmem_to_hbm [thread:$0]  (%p1145_p0), %s1083_s7, 128, %s1081_s15, %s448_s16  }
 0x16a PF: > { %s473_s11 = sand.u32 1, %s830_s18   ;;  %p1146_p7 = scmp.ne.s32.totalorder %s1136_s25, 0 }
 0x16b   : > { %p1147_p9 = scmp.ge.s32.totalorder %s842_s21, 2  ;;  %s474_s28 = scalar_lea.sflag [#allocation4], %s473_s11 }
 0x16d   : > { %p638_p12 = pnand %p1147_p9, %p1146_p7 }
 0x16f   : > { %825 = dma.done.wait (!%p638_p12), %s474_s28, 128  }
 0x170   : > { %827 = vsyncadd (!%p638_p12), %s474_s28, 4294967168  ;;  %p19_p2 = scmp.ge.s32.totalorder %s993_s14, 4   ;;  %s1148_s18 = smov %s834_s19 }
 0x171   : > { %s1149_s19 = smov %s838_s20  ;;  %s1150_s20 = smov %s1009_s27 }
 0x172   : > { %s1151_s21 = smov %s993_s14  ;;  %21 = sbr.rel (!%p19_p2) target bundleno = 6 (0x6), region = 93 }
 0x179   :  { %479 = vsyncpa [#allocation3], 1 }
 0x17a   :  { %481 = vsyncpa [#allocation3 + $0x1], 1 }
 0x17b   :  { %482 = vsyncpa [#allocation6], 1 }
 0x17c   :  { %483 = vsyncpa [#allocation4], 1 }
 0x17d   :  { %485 = vsyncpa [#allocation4 + $0x1], 1 }

</bundles_post_ra>
